<compile_context>
chip_gen: v7x
topology: tpu7x:2x2x1
jax: 0.10.0
libtpu: 0.0.40
codegen_flags: <defaults>
</compile_context>

<pallas_src>
import functools

import jax
import jax.numpy as jnp
from jax.experimental import pallas as pl
from jax.experimental.pallas import tpu as pltpu


def _qrank_kernel(x_ref, w1t_ref, b1_ref, w23_ref, b23_ref, out_ref):
    """q^T = W23_row @ tanh(W1^T @ X^T + b1_col) + b23   (feature-major)."""
    mm_dtype = x_ref.dtype  # f32 (validated path) or bf16 (fast path)

    # Layer 1 (the only activated layer): (h1, in) @ (in, tile_b) -> (h1, tile_b).
    h1 = jnp.dot(w1t_ref[...], x_ref[...], preferred_element_type=jnp.float32)
    h1 = jnp.tanh(h1 + b1_ref[...])        # bias broadcast over lanes; f32 tanh

    # Folded Identity layers (q_i[1] and q_j): (1, h1) @ (h1, tile_b) -> (1, tile_b).
    v = jnp.dot(w23_ref[...], h1.astype(mm_dtype),
                preferred_element_type=jnp.float32)
    out_ref[...] = (v + b23_ref[...]).astype(out_ref.dtype)


def _round_up(x, m):
    return ((x + m - 1) // m) * m


def _pick_tile_b(batch):
    """One full-extent tile for small/medium batches (zero extra grid-step
    overhead on single-TC v5e/v6e); for large batches, 128-lane-aligned tiles
    with an even number of grid steps so v7x's two TensorCores split the
    "parallel" grid evenly and each can double-buffer its own input DMAs."""
    if batch <= 4096:
        return batch
    n_steps = 2 * pl.cdiv(pl.cdiv(batch, 4096), 2)   # even, >= 2
    return _round_up(pl.cdiv(batch, n_steps), 128)


@functools.partial(jax.jit, static_argnames=("tile_b",))
def mlp_qrank_forward(obs, act, w1, b1, w2, b2, w3, b3, *, tile_b=None):
    """Pallas forward.  obs:(B,obs_dim), act:(B,act_dim) -> q:(B,).

    Weights use the (in_features, out_features) convention (transpose of
    PyTorch's nn.Linear.weight); biases are (1, out_features) rows.
    """
    B, obs_dim = obs.shape
    _, act_dim = act.shape
    in_dim, h1d = w1.shape
    assert in_dim == obs_dim + act_dim, (in_dim, obs_dim, act_dim)
    h2d = w2.shape[1]
    assert w3.shape == (h2d, 1), w3.shape

    dtype = obs.dtype
    hi = jax.lax.Precision.HIGHEST

    # Feature-major input: X^T = cat(obs, act, -1)^T -> (in_dim, B).
    x_t = jnp.concatenate([obs, act], axis=-1).T

    # W1^T (h1d, in_dim) == PyTorch nn.Linear.weight layout; b1 as a column.
    w1t = w1.T.astype(dtype)
    b1c = b1.reshape(h1d, 1).astype(jnp.float32)

    # Fold the Identity-activated layers: W23 = W2 @ W3, b23 = b2 @ W3 + b3.
    w23_row = jnp.dot(w2, w3, precision=hi).reshape(1, h1d).astype(dtype)
    b23 = (jnp.dot(b2, w3, precision=hi) + b3).astype(jnp.float32)   # (1, 1)

    if tile_b is None:
        tile_b = _pick_tile_b(B)
    n_tiles = pl.cdiv(B, tile_b)

    itemsize = jnp.dtype(dtype).itemsize
    cost = pl.CostEstimate(
        flops=2 * B * h1d * (in_dim + 1),
        transcendentals=B * h1d,
        bytes_accessed=itemsize * (B * (in_dim + 1) + h1d * (in_dim + 2) + 1),
    )

    rep = lambda shape: pl.BlockSpec(shape, lambda i: (0, 0))  # grid-invariant

    out = pl.pallas_call(
        _qrank_kernel,
        out_shape=jax.ShapeDtypeStruct((1, B), dtype),
        grid_spec=pltpu.PrefetchScalarGridSpec(
            num_scalar_prefetch=0,
            grid=(n_tiles,),
            in_specs=[
                pl.BlockSpec((in_dim, tile_b), lambda i: (0, i)),  # X^T tile
                rep((h1d, in_dim)),                                # W1^T
                rep((h1d, 1)),                                     # b1 column
                rep((1, h1d)),                                     # W2 @ W3 row
                rep((1, 1)),                                       # b2 @ W3 + b3
            ],
            # Lane-dense output: grid step i writes columns [i*tile_b, ...).
            out_specs=pl.BlockSpec((1, tile_b), lambda i: (0, i)),
        ),
        compiler_params=pltpu.CompilerParams(
            dimension_semantics=("parallel",)),
        cost_estimate=cost,
    )(x_t, w1t, b1c, w23_row, b23)

    return out.reshape(-1)                      # == torch.squeeze(q, -1)


def _init_linear(key, fan_in, fan_out, dtype=jnp.float32):
    """PyTorch-style uniform(-1/sqrt(fan_in), 1/sqrt(fan_in)) init."""
    kw, kb = jax.random.split(key)
    bound = 1.0 / jnp.sqrt(jnp.asarray(fan_in, dtype))
    w = jax.random.uniform(kw, (fan_in, fan_out), dtype, -bound, bound)
    b = jax.random.uniform(kb, (1, fan_out), dtype, -bound, bound)
    return w, b


def _reference_forward(obs, act, w1, b1, w2, b2, w3, b3):
    hi = jax.lax.Precision.HIGHEST
    x = jnp.concatenate([obs, act], axis=-1)
    h1 = jnp.tanh(jnp.dot(x, w1, precision=hi) + b1)      # Linear + Tanh
    h2 = jnp.dot(h1, w2, precision=hi) + b2               # Linear + Identity
    q = jnp.dot(h2, w3, precision=hi) + b3                # q_j: Linear + Identity
    return jnp.squeeze(q, axis=-1)


if __name__ == "__main__":
    # Shapes consistent with MLPQRankFunction(obs_dim=16, act_dim=6,
    # hidden_sizes=(32, 32), activation=nn.Tanh).
    obs_dim, act_dim, hidden1, hidden2 = 16, 6, 32, 32

    key = jax.random.PRNGKey(0)
    k1, k2, k3 = jax.random.split(key, 3)
    w1, b1 = _init_linear(k1, obs_dim + act_dim, hidden1)
    w2, b2 = _init_linear(k2, hidden1, hidden2)
    w3, b3 = _init_linear(k3, hidden2, 1)

    # (batch, forced tile) cases:
    #   B=8,   tile=None -> single full-extent tile.
    #   B=300, tile=None -> single full-extent tile (default heuristic).
    #   B=300, tile=128  -> 3-step grid with a clipped (ragged) final block,
    #                       exercising the no-pad multi-tile path.
    for batch, tile_b in ((8, None), (300, None), (300, 128)):
        ko, ka = jax.random.split(jax.random.fold_in(key, batch))
        obs = jax.random.normal(ko, (batch, obs_dim), jnp.float32)
        act = jax.random.normal(ka, (batch, act_dim), jnp.float32)

        q = jax.block_until_ready(
            mlp_qrank_forward(obs, act, w1, b1, w2, b2, w3, b3, tile_b=tile_b))
        q_ref = _reference_forward(obs, act, w1, b1, w2, b2, w3, b3)

        assert q.shape == (batch,), q.shape
        assert jnp.allclose(q, q_ref, atol=1e-4, rtol=1e-4), (
            float(jnp.max(jnp.abs(q - q_ref))))

    print("KERNEL_OK")
</pallas_src>

<mosaic_0001>
module attributes {stable_mosaic.version = 11 : i64} {
  func.func @_qrank_kernel(%arg0: i32, %arg1: memref<22x8xf32, #tpu.memory_space<vmem>>, %arg2: memref<32x22xf32, #tpu.memory_space<vmem>>, %arg3: memref<32x1xf32, #tpu.memory_space<vmem>>, %arg4: memref<1x32xf32, #tpu.memory_space<vmem>>, %arg5: memref<1x1xf32, #tpu.memory_space<vmem>>, %arg6: memref<1x8xf32, #tpu.memory_space<vmem>>) attributes {dimension_semantics = [#tpu.dimension_semantics<parallel>], iteration_bounds = array<i64: 1>, scalar_prefetch = 0 : i64, scratch_operands = 0 : i64, tpu.core_type = #tpu.core_type<tc>, window_params = [{transform_indices = @transform_0, window_bounds = array<i64: 22, 8>}, {pipeline_mode = #tpu.pipeline_mode<synchronous>, transform_indices = @transform_1, window_bounds = array<i64: 32, 22>}, {pipeline_mode = #tpu.pipeline_mode<synchronous>, transform_indices = @transform_2, window_bounds = array<i64: 32, 1>}, {pipeline_mode = #tpu.pipeline_mode<synchronous>, transform_indices = @transform_3, window_bounds = array<i64: 1, 32>}, {pipeline_mode = #tpu.pipeline_mode<synchronous>, transform_indices = @transform_4, window_bounds = array<i64: 1, 1>}, {transform_indices = @transform_5, window_bounds = array<i64: 1, 8>}]} {
    %c0 = arith.constant 0 : index
    %c0_0 = arith.constant 0 : index
    %0 = vector.load %arg2[%c0, %c0_0] : memref<32x22xf32, #tpu.memory_space<vmem>>, vector<32x22xf32>
    %c0_1 = arith.constant 0 : index
    %c0_2 = arith.constant 0 : index
    %1 = vector.load %arg1[%c0_1, %c0_2] : memref<22x8xf32, #tpu.memory_space<vmem>>, vector<22x8xf32>
    %cst = arith.constant dense<0.000000e+00> : vector<32x8xf32>
    %2 = tpu.matmul %0, %1, %cst {dimension_numbers = #tpu.dot_dimension_numbers<[1], [0], [0], [1], [0, 0, 1, 1], [], []>} : vector<32x22xf32>, vector<22x8xf32>, vector<32x8xf32> -> vector<32x8xf32>
    %c0_3 = arith.constant 0 : index
    %c0_4 = arith.constant 0 : index
    %3 = vector.load %arg3[%c0_3, %c0_4] : memref<32x1xf32, #tpu.memory_space<vmem>>, vector<32x1xf32>
    %4 = vector.broadcast %3 : vector<32x1xf32> to vector<32x8xf32>
    %5 = arith.addf %2, %4 : vector<32x8xf32>
    %6 = math.tanh %5 : vector<32x8xf32>
    %c0_5 = arith.constant 0 : index
    %c0_6 = arith.constant 0 : index
    %7 = vector.load %arg4[%c0_5, %c0_6] : memref<1x32xf32, #tpu.memory_space<vmem>>, vector<1x32xf32>
    %cst_7 = arith.constant dense<0.000000e+00> : vector<1x8xf32>
    %8 = tpu.matmul %7, %6, %cst_7 {dimension_numbers = #tpu.dot_dimension_numbers<[1], [0], [0], [1], [0, 0, 1, 1], [], []>} : vector<1x32xf32>, vector<32x8xf32>, vector<1x8xf32> -> vector<1x8xf32>
    %c0_8 = arith.constant 0 : index
    %c0_9 = arith.constant 0 : index
    %9 = vector.load %arg5[%c0_8, %c0_9] : memref<1x1xf32, #tpu.memory_space<vmem>>, vector<1x1xf32>
    %10 = vector.broadcast %9 : vector<1x1xf32> to vector<1x8xf32>
    %11 = arith.addf %8, %10 : vector<1x8xf32>
    %c0_10 = arith.constant 0 : index
    %c0_11 = arith.constant 0 : index
    %12 = vector.load %arg6[%c0_10, %c0_11] : memref<1x8xf32, #tpu.memory_space<vmem>>, vector<1x8xf32>
    tpu.vector_store %arg6[%c0_10, %c0_11], %11 {strides = array<i32>} : memref<1x8xf32, #tpu.memory_space<vmem>>, vector<1x8xf32>,
    return
  }
  func.func @transform_0(%arg0: i32) -> (i32, i32) {
    %c0_i32 = arith.constant 0 : i32
    %c0_i32_0 = arith.constant 0 : i32
    return %c0_i32, %arg0 : i32, i32
  }
  func.func @transform_1(%arg0: i32) -> (i32, i32) {
    %c0_i32 = arith.constant 0 : i32
    %c0_i32_0 = arith.constant 0 : i32
    %c0_i32_1 = arith.constant 0 : i32
    return %c0_i32, %c0_i32_0 : i32, i32
  }
  func.func @transform_2(%arg0: i32) -> (i32, i32) {
    %c0_i32 = arith.constant 0 : i32
    %c0_i32_0 = arith.constant 0 : i32
    %c0_i32_1 = arith.constant 0 : i32
    return %c0_i32, %c0_i32_0 : i32, i32
  }
  func.func @transform_3(%arg0: i32) -> (i32, i32) {
    %c0_i32 = arith.constant 0 : i32
    %c0_i32_0 = arith.constant 0 : i32
    %c0_i32_1 = arith.constant 0 : i32
    return %c0_i32, %c0_i32_0 : i32, i32
  }
  func.func @transform_4(%arg0: i32) -> (i32, i32) {
    %c0_i32 = arith.constant 0 : i32
    %c0_i32_0 = arith.constant 0 : i32
    %c0_i32_1 = arith.constant 0 : i32
    return %c0_i32, %c0_i32_0 : i32, i32
  }
  func.func @transform_5(%arg0: i32) -> (i32, i32) {
    %c0_i32 = arith.constant 0 : i32
    %c0_i32_0 = arith.constant 0 : i32
    return %c0_i32, %arg0 : i32, i32
  }
}

</mosaic_0001>

<bundles_post_ra>
// kernel: mlp_qrank_forward.1
= control target key start
LH: loop header
LB: loop body
LE: loop exit
PB: predicated region body
PF: predicated region fallthrough
CT: control target
= control target key end

     0   :  { %s443_s0 = inlined_call_operand.vmem [shape: f32[22,8], index: 0, kind: input, shape index: {}]   ;;  %s444_s1 = inlined_call_operand.vmem [shape: f32[32,22], index: 1, kind: input, shape index: {}]   ;;  %s445_s2 = inlined_call_operand.vmem [shape: f32[32,1], index: 2, kind: input, shape index: {}]   ;;  %s446_s3 = inlined_call_operand.vmem [shape: f32[1,32], index: 3, kind: input, shape index: {}]   ;;  %s447_s4 = inlined_call_operand.<no memory space> [shape: f32[1,1], index: 4, kind: input, shape index: {}]   ;;  %s448_s5 = inlined_call_operand.hbm [shape: f32[1,8], index: 5, kind: output, shape index: {}]  }
   0x1   :  { %v10_v0 = vstv %s447_s4 }
   0x2   :  { %11 = vst [vmem:[#allocation2] sm:$0x1] %v10_v0 }
   0x3   :  { %v27_v1 = vld [vmem:[%s443_s0] sm:$0xff]  ;;  %v28_v2 = vld [vmem:[%s443_s0 + $0x8] sm:$0xff]  ;;  %vm54_vm0 = vcmask 179200   ;;  %v29_v5 = vld [vmem:[%s443_s0 + $0x10] sm:$0x3f]  ;;  %vm67_vm1 = vcmask 1045504  }
   0x4   :  { %v302_v3 = vpack.c.bf16 %v28_v2, %v27_v1  ;;  %v23_v4 = vld [vmem:[%s444_s1] sm:$0xff]  ;;  %v351_v6 = vmov 0   ;;  %v32_v8 = vld [vmem:[%s445_s2 + $0x10] sm:$0xff]  ;;  %v31_v9 = vld [vmem:[%s445_s2 + $0x8] sm:$0xff] }
   0x5   :  { %285 = vmatprep.mubr.msk.f32.mxu0 %vm54_vm0, %v23_v4  ;;  %317 = vset.pattern.permute.xlu0 %v351_v6  ;;  %v30_v7 = vld [vmem:[%s445_s2] sm:$0xff] }
   0x6   :  { %303 = vmatprep.subr.bf16.mxu0 %v302_v3  ;;  %36 = vperm.xlu0 %317, %v30_v7  }
   0x7   :  { %305 = vmatpush3.bf16.msra.mxu0 %v302_v3  ;;  %318 = vset.pattern.permute.xlu1 %v351_v6 }
   0x8   :  { %12 = vsyncpa [#allocation4], 0  ;;  %283 = vmatprep.subr.msk.mxu0 %vm67_vm1, %v29_v5  ;;  %46 = vperm.xlu1 %318, %v32_v8   ;;  %v24_v10 = vld [vmem:[%s444_s1 + $0x8] sm:$0xff]  ;;  %v33_v11 = vld [vmem:[%s445_s2 + $0x18] sm:$0xff]  ;;  %v352_v15 = vmov 0.0|0.0   ;;  %vm353_vm2 = vmmov 0   ;;  %v167_v36 = vlaneseq }
   0x9   :  { %v25_v12 = vld [vmem:[%s444_s1 + $0x10] sm:$0xff]  ;;  %v161_v13 = vld [vmem:[#allocation2] sm:$0x1]  ;;  %v26_v14 = vld [vmem:[%s444_s1 + $0x18] sm:$0xff]  ;;  %306 = vmatprep.subr.bf16.mxu1 %v352_v15  ;;  %v354_v16 = vmov 0.0   ;;  %vm171_vm3 = vcmask 261120  }
   0xa   :  { %41 = vperm.xlu0 %317, %v31_v9   ;;  %299 = vmatprep.mubr.msk.f32.mxu1 %vm353_vm2, %v354_v16  ;;  %v160_v35 = vld [vmem:[%s446_s3] sm:$0x1]  ;;  %v168_v37 = vshrl.u32 %v167_v36, 7  ;;  %s355_s15 = smov [#allocation3]   ;;  %vm245_vm4 = vcmask 57344  }
   0xb   :  { %284 = vmatpush3.msk.msra.mxu0 %vm67_vm1, %v29_v5  ;;  %s253_s16 = sshll.u32 %s355_s15, 4  ;;  %s254_s16 = int_to_ptr.vmem [resolvable:$true] %s253_s16 }
   0xc   :  { %286 = vmatmul.mubr.msk.f32.vlgmr.msra.gmra.mrb[0].mxu0 %vm54_vm0, %v24_v10  ;;  %51 = vperm.xlu1 %318, %v33_v11   ;;  %v169_v38 = vsub.s32 0, %v168_v37  ;;  %s327_s17 = scalar_lea.vmem %s254_s16, 16  ;;  %s331_s18 = scalar_lea.vmem %s254_s16, 32 }
   0xd   :  { %288 = vmatprep.mubr.msk.f32.mxu0 %vm54_vm0, %v25_v12  ;;  %p328_p0 = scmp.ne.s32.totalorder %s254_s16, %s327_s17  ;;  %p332_p1 = scmp.lt.s32.totalorder %s254_s16, %s254_s16 }
   0xe   :  { %164 = vperm.xlu0 %317, %v161_v13   ;;  %p333_p2 = scmp.lt.s32.totalorder %s331_s18, %s327_s17 }
  0x10   :  { %289 = vmatmul.mubr.msk.f32.gmra.mrb[2].mxu0 %vm54_vm0, %v26_v14  ;;  %p334_p3 = por %p333_p2, %p332_p1 }
  0x12   :  { %p335_p4 = pnand %p334_p3, %p328_p0 }
  0x85   :  { %v37_v17 = vpop.permute.xlu0 %36 }
  0x87   :  { %v47_v18 = vpop.permute.xlu1 %46 }
  0x89   :  { %v42_v19 = vpop.permute.xlu0 %41 }
  0x8b   :  { %v52_v24 = vpop.permute.xlu1 %51 }
  0x8d   :  { %v165_v39 = vpop.permute.xlu0 %164 }
  0x8e   :  { %v170_v40 = vrot.slane %v165_v39, %v169_v38 }
  0xdf   :  { %v287_v20 = vpop.f32.mrb[0].mxu0 }
  0xe0   :  { %v143_v21 = vadd.f32 %v287_v20, %v42_v19  ;;  %v137_v22 = vpop.f32.mrb[1].mxu0 }
  0xe1   :  { %v138_v23 = vadd.f32 %v137_v22, %v37_v17 }
  0xe2   :  { %319 = vtanh.f32 %v143_v21 }
  0xe3   :  { %321 = vtanh.f32 %v138_v23  ;;  %v290_v25 = vpop.f32.mrb[2].mxu0 }
  0xe4   :  { %v153_v26 = vadd.f32 %v290_v25, %v52_v24  ;;  %v147_v27 = vpop.f32.mrb[3].mxu0 }
  0xe5   :  { %v148_v28 = vadd.f32 %v147_v27, %v47_v18 }
  0xe6   :  { %323 = vtanh.f32 %v153_v26 }
  0xe7   :  { %325 = vtanh.f32 %v148_v28 }
  0xec   :  { %v320_v29 = vpop.eup %319 }
  0xed   :  { %v322_v30 = vpop.eup %321 }
  0xee   :  { %v307_v31 = vpack.c.bf16 %v320_v29, %v322_v30 }
  0xf0   :  { %v324_v32 = vpop.eup %323  ;;  %308 = vmatpush3.bf16.msra.mxu1 %v307_v31 }
  0xf1   :  { %v326_v33 = vpop.eup %325  ;;  %309 = vmatprep.subr.bf16.mxu1 %v352_v15 }
  0xf2   :  { %v310_v34 = vpack.c.bf16 %v324_v32, %v326_v33 }
  0xf4   :  { %311 = vmatpush3.bf16.msra.mxu1 %v310_v34 }
  0xf7   :  { %300 = vmatmul.mubr.msk.f32.vlgmr.msra.gmra.mrb[0].mxu1 %vm171_vm3, %v160_v35 }
 0x1ca   :  { %v241_v41 = vpop.f32.mrb[0].mxu1 }
 0x1cb   :  { %v242_v42 = vadd.f32 %v241_v41, %v170_v40  ;;  %v301_v43 = vpop.f32.mrb[1].mxu1 }
 0x1cd   :  { %246 = vst.msk [vmem:[#allocation3] sm:$0x1] %vm245_vm4, %v242_v42 }
 0x1ce   :  { %338 = shalt.err (!%p335_p4)
}
 0x1cf   :  { %s339_s20 = scalar_lea.hbm %s448_s5, 16 }
 0x1d0   :  { %p340_p5 = scmp.ne.s32.totalorder %s448_s5, %s339_s20  ;;  %p343_p6 = scmp.lt.u32.totalorder %s339_s20, %s448_s5 }
 0x1d2   :  { %p345_p7 = pnand %p343_p6, %p340_p5 }
 0x1d4   :  { %348 = shalt.err (!%p345_p7)
}
 0x1d5   :  { %256 = dma.vmem_to_hbm [thread:$0]  %s254_s16, 16, %s448_s5, [#allocation4]  }
 0x1d6   :  { %349 = dma.done.wait [#allocation4], 16  }
 0x1d7   :  { %350 = vsyncadd [#allocation4], 4294967280 }
 0x1d8   :  { %260 = vsyncpa [#allocation4], 1 }

</bundles_post_ra>
